<compile_context>
chip_gen: v6e
topology: v6e:2x2x1
jax: 0.10.0
libtpu: 0.0.40
codegen_flags: <defaults>
</compile_context>

<pallas_src>
import functools

import jax
import jax.numpy as jnp
import numpy as np
from jax.experimental import pallas as pl
from jax.experimental.pallas import tpu as pltpu

EPS = 1e-6
KV_BLOCK = 128          # KV-sequence tile for flash attention (multiple of 128 lanes)


def _pick_tile(dim, target=512):
    """Largest multiple-of-128 divisor of `dim` that is <= target, else the full dim."""
    if dim <= target:
        return dim
    t = (target // 128) * 128
    while t >= 128:
        if dim % t == 0:
            return t
        t -= 128
    return dim


# ----------------------------- Pallas kernels ------------------------------ #

def _rmsnorm_qkv_kernel(x_ref, ln_ref, w_ref, b_ref, o_ref):
    # RMSNorm prologue fused into the (concatenated) QKV projection.
    x = x_ref[...]                                               # (L, H)
    xn = ln_ref[...] * (x * jax.lax.rsqrt(jnp.mean(x * x, axis=-1, keepdims=True) + EPS))
    o_ref[...] = jnp.dot(xn, w_ref[...].astype(jnp.float32),
                         preferred_element_type=jnp.float32) + b_ref[...]


def rmsnorm_qkv(x, ln_w, w, b, tn=None):
    # x: (L, H) f32, ln_w: (1, H) f32, w: (H, N) bf16, b: (1, N) f32
    L, H = x.shape
    N = w.shape[1]
    tn = _pick_tile(N) if tn is None else tn
    return pl.pallas_call(
        _rmsnorm_qkv_kernel,
        grid=(N // tn,),
        in_specs=[
            pl.BlockSpec((L, H), lambda j: (0, 0)),
            pl.BlockSpec((1, H), lambda j: (0, 0)),
            pl.BlockSpec((H, tn), lambda j: (0, j)),
            pl.BlockSpec((1, tn), lambda j: (0, j)),
        ],
        out_specs=pl.BlockSpec((L, tn), lambda j: (0, j)),
        out_shape=jax.ShapeDtypeStruct((L, N), jnp.float32),
        compiler_params=pltpu.CompilerParams(dimension_semantics=("parallel",)),
    )(x, ln_w, w, b)


def _linear_residual_kernel(x_ref, w_ref, b_ref, res_ref, o_ref):
    # out = residual + x @ W + b   (residual-add fused into the o_proj epilogue)
    o_ref[...] = (res_ref[...] + b_ref[...] +
                  jnp.dot(x_ref[...], w_ref[...].astype(jnp.float32),
                          preferred_element_type=jnp.float32))


def linear_residual(x, w, b, res, tn=None):
    L, K = x.shape
    N = w.shape[1]
    tn = _pick_tile(N) if tn is None else tn
    return pl.pallas_call(
        _linear_residual_kernel,
        grid=(N // tn,),
        in_specs=[
            pl.BlockSpec((L, K), lambda j: (0, 0)),
            pl.BlockSpec((K, tn), lambda j: (0, j)),
            pl.BlockSpec((1, tn), lambda j: (0, j)),
            pl.BlockSpec((L, tn), lambda j: (0, j)),
        ],
        out_specs=pl.BlockSpec((L, tn), lambda j: (0, j)),
        out_shape=jax.ShapeDtypeStruct((L, N), jnp.float32),
        compiler_params=pltpu.CompilerParams(dimension_semantics=("parallel",)),
    )(x, w, b, res)


def _flash_attn_kernel(q_ref, k_ref, v_ref, mask_ref, o_ref, m_sc, l_sc, acc_sc):
    # Online-softmax attention over KV blocks for one KV head.
    # q_ref: (1, GL, D)  k_ref: (1, D, ts)  v_ref: (1, ts, D)  mask_ref: (GL, ts)
    s_idx = pl.program_id(1)

    @pl.when(s_idx == 0)
    def _():
        m_sc[...] = jnp.full(m_sc.shape, -jnp.inf, m_sc.dtype)
        l_sc[...] = jnp.zeros(l_sc.shape, l_sc.dtype)
        acc_sc[...] = jnp.zeros(acc_sc.shape, acc_sc.dtype)

    s = jnp.dot(q_ref[0], k_ref[0], preferred_element_type=jnp.float32) + mask_ref[...]
    m_new = jnp.maximum(m_sc[...], jnp.max(s, axis=-1, keepdims=True))
    alpha = jnp.exp(m_sc[...] - m_new)
    p = jnp.exp(s - m_new)
    l_sc[...] = alpha * l_sc[...] + jnp.sum(p, axis=-1, keepdims=True)
    acc_sc[...] = alpha * acc_sc[...] + jnp.dot(p, v_ref[0],
                                                preferred_element_type=jnp.float32)
    m_sc[...] = m_new

    @pl.when(s_idx == pl.num_programs(1) - 1)
    def _():
        o_ref[0] = acc_sc[...] * pl.reciprocal(l_sc[...], approx=True)


def flash_attention(q, k, v, mask, ts=KV_BLOCK):
    # q: (nkv, GL, D)  k: (nkv, D, Sp)  v: (nkv, Sp, D)  mask: (GL, Sp); Sp % ts == 0
    nkv, GL, D = q.shape
    Sp = k.shape[-1]
    return pl.pallas_call(
        _flash_attn_kernel,
        grid=(nkv, Sp // ts),
        in_specs=[
            pl.BlockSpec((1, GL, D), lambda h, s: (h, 0, 0)),
            pl.BlockSpec((1, D, ts), lambda h, s: (h, 0, s)),
            pl.BlockSpec((1, ts, D), lambda h, s: (h, s, 0)),
            pl.BlockSpec((GL, ts), lambda h, s: (0, s)),
        ],
        out_specs=pl.BlockSpec((1, GL, D), lambda h, s: (h, 0, 0)),
        out_shape=jax.ShapeDtypeStruct((nkv, GL, D), jnp.float32),
        scratch_shapes=[
            pltpu.VMEM((GL, 1), jnp.float32),   # running max
            pltpu.VMEM((GL, 1), jnp.float32),   # running denom
            pltpu.VMEM((GL, D), jnp.float32),   # accumulator
        ],
        compiler_params=pltpu.CompilerParams(
            dimension_semantics=("parallel", "arbitrary")),
    )(q, k, v, mask)


def _mlp_kernel(x_ref, ln_ref, wg_ref, wu_ref, wd_ref, o_ref, xn_sc, acc_sc):
    # Fully fused MLP block: RMSNorm prologue, SwiGLU tiled over the intermediate dim,
    # residual-add epilogue.  Grid axis = intermediate-dim blocks (reduction).
    i = pl.program_id(0)

    @pl.when(i == 0)
    def _():
        x = x_ref[...]
        xn_sc[...] = ln_ref[...] * (x * jax.lax.rsqrt(
            jnp.mean(x * x, axis=-1, keepdims=True) + EPS))
        acc_sc[...] = jnp.zeros(acc_sc.shape, acc_sc.dtype)

    xn = xn_sc[...]
    g = jnp.dot(xn, wg_ref[...].astype(jnp.float32), preferred_element_type=jnp.float32)
    u = jnp.dot(xn, wu_ref[...].astype(jnp.float32), preferred_element_type=jnp.float32)
    h = (g * jax.nn.sigmoid(g)) * u
    acc_sc[...] += jnp.dot(h, wd_ref[...].astype(jnp.float32),
                           preferred_element_type=jnp.float32)

    @pl.when(i == pl.num_programs(0) - 1)
    def _():
        o_ref[...] = x_ref[...] + acc_sc[...]


def mlp_block(x, ln_w, wg, wu, wd, ti=None):
    L, H = x.shape
    I = wg.shape[1]
    ti = _pick_tile(I) if ti is None else ti
    return pl.pallas_call(
        _mlp_kernel,
        grid=(I // ti,),
        in_specs=[
            pl.BlockSpec((L, H), lambda i: (0, 0)),
            pl.BlockSpec((1, H), lambda i: (0, 0)),
            pl.BlockSpec((H, ti), lambda i: (0, i)),
            pl.BlockSpec((H, ti), lambda i: (0, i)),
            pl.BlockSpec((ti, H), lambda i: (i, 0)),
        ],
        out_specs=pl.BlockSpec((L, H), lambda i: (0, 0)),
        out_shape=jax.ShapeDtypeStruct((L, H), jnp.float32),
        scratch_shapes=[pltpu.VMEM((L, H), jnp.float32),   # normalized activations
                        pltpu.VMEM((L, H), jnp.float32)],  # down-proj accumulator
        compiler_params=pltpu.CompilerParams(dimension_semantics=("arbitrary",)),
    )(x, ln_w, wg, wu, wd)


def _rmsnorm_lmhead_argmax_kernel(x_ref, ln_ref, w_ref, o_ref, xn_sc, m_sc, i_sc):
    # Final RMSNorm + lm_head + running argmax, vocab axis tiled (logits never materialized).
    j = pl.program_id(0)
    tv = w_ref.shape[1]

    @pl.when(j == 0)
    def _():
        x = x_ref[...]
        xn_sc[...] = ln_ref[...] * (x * jax.lax.rsqrt(
            jnp.mean(x * x, axis=-1, keepdims=True) + EPS))
        m_sc[...] = jnp.full(m_sc.shape, -jnp.inf, m_sc.dtype)
        i_sc[...] = jnp.zeros(i_sc.shape, i_sc.dtype)

    logits = jnp.dot(xn_sc[...], w_ref[...].astype(jnp.float32),
                     preferred_element_type=jnp.float32)             # (1, tv)
    idx = jax.lax.broadcasted_iota(jnp.int32, logits.shape, 1) + j * tv
    bmax = jnp.max(logits, axis=-1, keepdims=True)                   # (1, 1)
    cand = jnp.where(logits == bmax, idx, jnp.int32(2 ** 30))
    bidx = jnp.min(cand, axis=-1, keepdims=True)                     # first max in block
    better = bmax > m_sc[...]                                        # strict > keeps earliest
    i_sc[...] = jnp.where(better, bidx, i_sc[...])
    m_sc[...] = jnp.where(better, bmax, m_sc[...])

    @pl.when(j == pl.num_programs(0) - 1)
    def _():
        o_ref[...] = i_sc[...]


def rmsnorm_lmhead_argmax(x, ln_w, w, tv=None):
    _, H = x.shape
    V = w.shape[1]
    tv = _pick_tile(V) if tv is None else tv
    return pl.pallas_call(
        _rmsnorm_lmhead_argmax_kernel,
        grid=(V // tv,),
        in_specs=[
            pl.BlockSpec((1, H), lambda j: (0, 0)),
            pl.BlockSpec((1, H), lambda j: (0, 0)),
            pl.BlockSpec((H, tv), lambda j: (0, j)),
        ],
        out_specs=pl.BlockSpec((1, 1), lambda j: (0, 0)),
        out_shape=jax.ShapeDtypeStruct((1, 1), jnp.int32),
        scratch_shapes=[pltpu.VMEM((1, H), jnp.float32),
                        pltpu.VMEM((1, 1), jnp.float32),
                        pltpu.VMEM((1, 1), jnp.int32)],
        compiler_params=pltpu.CompilerParams(dimension_semantics=("arbitrary",)),
    )(x, ln_w, w)


# -------------------------------- JAX glue --------------------------------- #

def rotate_half_last(x, half):
    x1, x2 = x[..., :half], x[..., half:]
    return jnp.concatenate([-x2, x1], axis=-1)


def rotate_half_dim2(x, half):
    x1, x2 = x[..., :half, :], x[..., half:, :]
    return jnp.concatenate([-x2, x1], axis=-2)


def qwenvl_partf_forward(params, past_keys, past_values, hidden_states,
                         cos_q, sin_q, cos_k, sin_k,
                         ids_len, kv_seq_len, attn_mask_flag, mask_base,
                         num_heads, num_kv_heads, head_dim):
    L = ids_len
    D = head_dim
    half = D // 2
    groups = num_heads // num_kv_heads
    GL = groups * L
    NQ = num_heads * D
    NK = num_kv_heads * D

    S = kv_seq_len
    Sp = ((S + KV_BLOCK - 1) // KV_BLOCK) * KV_BLOCK          # padded KV length

    # attention_mask = (self.attention_mask[:, :ids_len, :kv_seq_len] * flag).float()
    mask = (mask_base[:, :L, :S] * jnp.int8(attn_mask_flag)).astype(jnp.float32)[0]  # (L, S)
    # Tile over GQA groups (row order (g, l) matches the q blocks below) and pad the KV
    # axis; padded key columns get a huge negative additive bias so softmax ignores them.
    mask_gl = jnp.tile(mask, (groups, 1))                                             # (GL, S)
    mask_gl = jnp.pad(mask_gl, ((0, 0), (0, Sp - S)), constant_values=-1e30)          # (GL, Sp)

    hs = hidden_states[0]                                     # (L, H)
    save_key, save_value = [], []

    for i, lp in enumerate(params['layers']):
        # --- fused RMSNorm + concatenated QKV projection (one weight stream) --- #
        qkv = rmsnorm_qkv(hs, lp['ln1_w'], lp['qkv_wt'], lp['qkv_b'])     # (L, NQ+2*NK)
        q = qkv[:, :NQ].reshape(L, num_heads, D).transpose(1, 0, 2)                  # (nh, L, D)
        k = qkv[:, NQ:NQ + NK].reshape(L, 1, num_kv_heads, D).transpose(2, 1, 3, 0)  # (nkv,1,D,L)
        v = qkv[:, NQ + NK:].reshape(L, 1, num_kv_heads, D).transpose(2, 1, 0, 3)    # (nkv,1,L,D)

        # rotary embedding (tiny decode-time tensors; kept in glue)
        q = q * cos_q + rotate_half_last(q, half) * sin_q
        k = k * cos_k + rotate_half_dim2(k, half) * sin_k

        # KV cache concat (module interface returns the grown cache every step)
        # TODO(synk): pre-allocate a max-length cache + input_output_aliases in-place update.
        k = jnp.concatenate([past_keys[i], k], axis=-1)       # (nkv, 1, D, S)
        v = jnp.concatenate([past_values[i], v], axis=2)      # (nkv, 1, S, D)
        save_key.append(k)
        save_value.append(v)

        # --- GQA flash attention: no jnp.repeat; grid over kv heads, q carries GL rows --- #
        q_g = q.reshape(num_kv_heads, GL, D)                  # (nkv, groups*L, D)
        k_p = jnp.pad(k[:, 0], ((0, 0), (0, 0), (0, Sp - S)))  # (nkv, D, Sp)
        v_p = jnp.pad(v[:, 0], ((0, 0), (0, Sp - S), (0, 0)))  # (nkv, Sp, D)

        attn = flash_attention(q_g, k_p, v_p, mask_gl)        # (nkv, GL, D)
        attn = attn.reshape(num_heads, L, D).transpose(1, 0, 2).reshape(L, NQ)

        # --- fused o_proj + residual-add --- #
        hs = linear_residual(attn, lp['o_wt'], lp['o_b'], hs)

        # --- fused RMSNorm + SwiGLU MLP (tiled over I) + residual-add --- #
        hs = mlp_block(hs, lp['ln2_w'], lp['gate_wt'], lp['up_wt'], lp['down_wt'])

    last = hs[-1:, :]                                         # (1, H)
    max_logit_ids = rmsnorm_lmhead_argmax(last, params['norm_w'], params['lm_wt'])

    return save_key, save_value, kv_seq_len + 1, max_logit_ids


# ------------------------- pure-JAX reference (check) ---------------------- #

def reference_forward(params, past_keys, past_values, hidden_states,
                      cos_q, sin_q, cos_k, sin_k,
                      ids_len, kv_seq_len, attn_mask_flag, mask_base,
                      num_heads, num_kv_heads, head_dim):
    L = ids_len
    D = head_dim
    half = D // 2
    groups = num_heads // num_kv_heads
    NQ = num_heads * D
    NK = num_kv_heads * D
    mask = (mask_base[:, :L, :kv_seq_len] * jnp.int8(attn_mask_flag)).astype(jnp.float32)

    def rn(x, w):
        return w * (x / jnp.sqrt(jnp.mean(x * x, axis=-1, keepdims=True) + EPS))

    f32 = jnp.float32
    hs = hidden_states[0]
    save_key, save_value = [], []
    for i, lp in enumerate(params['layers']):
        hn = rn(hs, lp['ln1_w'])
        qkv = hn @ lp['qkv_wt'].astype(f32) + lp['qkv_b']
        q = qkv[:, :NQ].reshape(L, num_heads, D).transpose(1, 0, 2)
        k = qkv[:, NQ:NQ + NK].reshape(L, 1, num_kv_heads, D).transpose(2, 1, 3, 0)
        v = qkv[:, NQ + NK:].reshape(L, 1, num_kv_heads, D).transpose(2, 1, 0, 3)
        q = q * cos_q + rotate_half_last(q, half) * sin_q
        k = k * cos_k + rotate_half_dim2(k, half) * sin_k
        k = jnp.concatenate([past_keys[i], k], axis=-1)
        v = jnp.concatenate([past_values[i], v], axis=2)
        save_key.append(k)
        save_value.append(v)
        k_rep = jnp.repeat(k[:, 0], groups, axis=0)
        v_rep = jnp.repeat(v[:, 0], groups, axis=0)
        s = jnp.einsum('hld,hds->hls', q, k_rep) + mask
        p = jax.nn.softmax(s, axis=-1)
        a = jnp.einsum('hls,hsd->hld', p, v_rep)
        a = a.transpose(1, 0, 2).reshape(L, NQ)
        a = a @ lp['o_wt'].astype(f32) + lp['o_b']
        hs = hs + a
        residual = hs
        hn2 = rn(hs, lp['ln2_w'])
        g = hn2 @ lp['gate_wt'].astype(f32)
        u = hn2 @ lp['up_wt'].astype(f32)
        hs = ((g * jax.nn.sigmoid(g)) * u) @ lp['down_wt'].astype(f32)
        hs = hs + residual
    last = rn(hs[-1:, :], params['norm_w'])
    logits = last @ params['lm_wt'].astype(f32)
    return (save_key, save_value, kv_seq_len + 1,
            jnp.argmax(logits, axis=-1, keepdims=True).astype(jnp.int32))


# ------------------------------ params / inputs ---------------------------- #

def init_params(key, num_layers, H, num_heads, num_kv_heads, D, I, V):
    scale_factor = float(D) ** (-0.25)   # applied to q/k proj weights+biases as in __init__

    def rnd(k, shape, s=0.05):
        return jax.random.normal(k, shape, dtype=jnp.float32) * s

    bf16 = jnp.bfloat16
    layers = []
    lkeys = jax.random.split(key, num_layers)
    for i in range(num_layers):
        ks = jax.random.split(lkeys[i], 12)
        q_w = rnd(ks[0], (num_heads * D, H)) * scale_factor
        q_b = rnd(ks[1], (num_heads * D,)) * scale_factor
        k_w = rnd(ks[2], (num_kv_heads * D, H)) * scale_factor
        k_b = rnd(ks[3], (num_kv_heads * D,)) * scale_factor
        v_w = rnd(ks[4], (num_kv_heads * D, H))
        v_b = rnd(ks[5], (num_kv_heads * D,))
        o_w = rnd(ks[6], (H, num_heads * D))
        gate_w = rnd(ks[7], (I, H))
        up_w = rnd(ks[8], (I, H))
        down_w = rnd(ks[9], (H, I))
        ln1 = 1.0 + rnd(ks[10], (H,), 0.1)
        ln2 = 1.0 + rnd(ks[11], (H,), 0.1)
        qkv_wt = jnp.concatenate([q_w.T, k_w.T, v_w.T], axis=1).astype(bf16)   # (H, NQ+2NK)
        qkv_b = jnp.concatenate([q_b, k_b, v_b])[None, :]                      # (1, NQ+2NK)
        layers.append(dict(
            ln1_w=ln1[None, :],
            qkv_wt=qkv_wt, qkv_b=qkv_b,
            o_wt=o_w.T.astype(bf16), o_b=jnp.zeros((1, H), jnp.float32),  # Qwen2 o_proj: no bias
            ln2_w=ln2[None, :],
            gate_wt=gate_w.T.astype(bf16), up_wt=up_w.T.astype(bf16),
            down_wt=down_w.T.astype(bf16),
        ))
    kf1, kf2 = jax.random.split(jax.random.fold_in(key, 12345))
    norm_w = 1.0 + rnd(kf1, (H,), 0.1)
    lm_w = rnd(kf2, (V, H))
    return dict(layers=layers, norm_w=norm_w[None, :], lm_wt=lm_w.T.astype(bf16))


if __name__ == "__main__":
    # Small, module-consistent shapes (exercise multi-block KV, MLP and vocab grids).
    H = 64            # hidden size
    NUM_HEADS = 4
    NUM_KV_HEADS = 2
    D = 16            # head_dim
    NUM_LAYERS = 2
    I = 1024          # mlp intermediate  -> 2 blocks of 512 in the fused MLP kernel
    V = 1024          # vocab             -> 2 blocks of 512 in the lm_head kernel
    L = 8             # ids_len
    PAST = 140        # history_len
    KV = L + PAST     # kv_seq_len = 148  -> padded to 256 -> 2 KV blocks of 128
    MAX_SEQ = 256

    key = jax.random.PRNGKey(0)
    kp, kh, kk, kv = jax.random.split(key, 4)

    params = init_params(kp, NUM_LAYERS, H, NUM_HEADS, NUM_KV_HEADS, D, I, V)

    hidden_states = jax.random.normal(kh, (1, L, H), dtype=jnp.float32)
    past_keys = [jax.random.normal(jax.random.fold_in(kk, i),
                                   (NUM_KV_HEADS, 1, D, PAST), dtype=jnp.float32) * 0.1
                 for i in range(NUM_LAYERS)]
    past_values = [jax.random.normal(jax.random.fold_in(kv, i),
                                     (NUM_KV_HEADS, 1, PAST, D), dtype=jnp.float32) * 0.1
                   for i in range(NUM_LAYERS)]

    # rotary embeddings (positions of the new query tokens)
    pos = jnp.arange(PAST, PAST + L, dtype=jnp.float32)
    inv_freq = 1.0 / (10000.0 ** (jnp.arange(0, D, 2, dtype=jnp.float32) / D))
    freqs = pos[:, None] * inv_freq[None, :]
    emb = jnp.concatenate([freqs, freqs], axis=-1)        # (L, D)
    cos_q = jnp.cos(emb)[None]                            # (1, L, D)   broadcasts with q
    sin_q = jnp.sin(emb)[None]
    cos_k = jnp.cos(emb).T[None, None]                    # (1, 1, D, L) broadcasts with k
    sin_k = jnp.sin(emb).T[None, None]

    # attention_mask buffer from __init__: (1 - tril) * -128, int8
    mask_base = ((1 - jnp.tril(jnp.ones((1, MAX_SEQ, MAX_SEQ), dtype=jnp.int32))) * (-128)
                 ).astype(jnp.int8)
    attn_mask_flag = 1   # the int8 scalar input

    run = functools.partial(
        qwenvl_partf_forward,
        ids_len=L, kv_seq_len=KV, attn_mask_flag=attn_mask_flag, mask_base=mask_base,
        num_heads=NUM_HEADS, num_kv_heads=NUM_KV_HEADS, head_dim=D)

    save_k, save_v, new_kv_len, max_id = run(
        params, past_keys, past_values, hidden_states, cos_q, sin_q, cos_k, sin_k)
    jax.block_until_ready((save_k, save_v, max_id))

    # cross-check against a pure-JAX reference (same bf16-stored weights)
    ref_k, ref_v, ref_len, ref_id = reference_forward(
        params, past_keys, past_values, hidden_states, cos_q, sin_q, cos_k, sin_k,
        L, KV, attn_mask_flag, mask_base, NUM_HEADS, NUM_KV_HEADS, D)

    for a, b in zip(save_k, ref_k):
        np.testing.assert_allclose(np.asarray(a), np.asarray(b), rtol=1e-2, atol=1e-2)
    for a, b in zip(save_v, ref_v):
        np.testing.assert_allclose(np.asarray(a), np.asarray(b), rtol=1e-2, atol=1e-2)
    assert new_kv_len == ref_len
    assert int(np.asarray(max_id)[0, 0]) == int(np.asarray(ref_id)[0, 0])

    print("KERNEL_OK")
</pallas_src>

<mosaic_0001>
module attributes {stable_mosaic.version = 11 : i64} {
  func.func @_rmsnorm_qkv_kernel(%arg0: i32, %arg1: memref<8x64xf32, #tpu.memory_space<vmem>>, %arg2: memref<1x64xf32, #tpu.memory_space<vmem>>, %arg3: memref<64x128xbf16, #tpu.memory_space<vmem>>, %arg4: memref<1x128xf32, #tpu.memory_space<vmem>>, %arg5: memref<8x128xf32, #tpu.memory_space<vmem>>) attributes {dimension_semantics = [#tpu.dimension_semantics<parallel>], iteration_bounds = array<i64: 1>, scalar_prefetch = 0 : i64, scratch_operands = 0 : i64, tpu.core_type = #tpu.core_type<tc>, window_params = [{pipeline_mode = #tpu.pipeline_mode<synchronous>, transform_indices = @transform_0, window_bounds = array<i64: 8, 64>}, {pipeline_mode = #tpu.pipeline_mode<synchronous>, transform_indices = @transform_1, window_bounds = array<i64: 1, 64>}, {transform_indices = @transform_2, window_bounds = array<i64: 64, 128>}, {transform_indices = @transform_3, window_bounds = array<i64: 1, 128>}, {transform_indices = @transform_4, window_bounds = array<i64: 8, 128>}]} {
    %c0 = arith.constant 0 : index
    %c0_0 = arith.constant 0 : index
    %0 = vector.load %arg1[%c0, %c0_0] : memref<8x64xf32, #tpu.memory_space<vmem>>, vector<8x64xf32>
    %c0_1 = arith.constant 0 : index
    %c0_2 = arith.constant 0 : index
    %1 = vector.load %arg2[%c0_1, %c0_2] : memref<1x64xf32, #tpu.memory_space<vmem>>, vector<1x64xf32>
    %2 = arith.mulf %0, %0 : vector<8x64xf32>
    %cst = arith.constant dense<0.000000e+00> : vector<8xf32>
    %3 = vector.multi_reduction <add>, %2, %cst [1] : vector<8x64xf32> to vector<8xf32>
    %4 = vector.shape_cast %3 : vector<8xf32> to vector<8x1xf32>
    %cst_3 = arith.constant 6.400000e+01 : f32
    %5 = vector.broadcast %cst_3 : f32 to vector<8x1xf32>
    %6 = arith.divf %4, %5 : vector<8x1xf32>
    %cst_4 = arith.constant 9.99999997E-7 : f32
    %7 = vector.broadcast %cst_4 : f32 to vector<8x1xf32>
    %8 = arith.addf %6, %7 : vector<8x1xf32>
    %9 = math.rsqrt %8 : vector<8x1xf32>
    %10 = vector.broadcast %9 : vector<8x1xf32> to vector<8x64xf32>
    %11 = arith.mulf %0, %10 : vector<8x64xf32>
    %12 = vector.broadcast %1 : vector<1x64xf32> to vector<8x64xf32>
    %13 = arith.mulf %12, %11 : vector<8x64xf32>
    %c0_5 = arith.constant 0 : index
    %c0_6 = arith.constant 0 : index
    %14 = vector.load %arg3[%c0_5, %c0_6] : memref<64x128xbf16, #tpu.memory_space<vmem>>, vector<64x128xbf16>
    %15 = arith.extf %14 : vector<64x128xbf16> to vector<64x128xf32>
    %cst_7 = arith.constant dense<0.000000e+00> : vector<8x128xf32>
    %16 = tpu.matmul %13, %15, %cst_7 {dimension_numbers = #tpu.dot_dimension_numbers<[1], [0], [0], [1], [0, 0, 1, 1], [], []>} : vector<8x64xf32>, vector<64x128xf32>, vector<8x128xf32> -> vector<8x128xf32>
    %c0_8 = arith.constant 0 : index
    %c0_9 = arith.constant 0 : index
    %17 = vector.load %arg4[%c0_8, %c0_9] : memref<1x128xf32, #tpu.memory_space<vmem>>, vector<1x128xf32>
    %18 = vector.broadcast %17 : vector<1x128xf32> to vector<8x128xf32>
    %19 = arith.addf %16, %18 : vector<8x128xf32>
    %c0_10 = arith.constant 0 : index
    %c0_11 = arith.constant 0 : index
    %20 = vector.load %arg5[%c0_10, %c0_11] : memref<8x128xf32, #tpu.memory_space<vmem>>, vector<8x128xf32>
    tpu.vector_store %arg5[%c0_10, %c0_11], %19 {strides = array<i32>} : memref<8x128xf32, #tpu.memory_space<vmem>>, vector<8x128xf32>,
    return
  }
  func.func @transform_0(%arg0: i32) -> (i32, i32) {
    %c0_i32 = arith.constant 0 : i32
    %c0_i32_0 = arith.constant 0 : i32
    %c0_i32_1 = arith.constant 0 : i32
    return %c0_i32, %c0_i32_0 : i32, i32
  }
  func.func @transform_1(%arg0: i32) -> (i32, i32) {
    %c0_i32 = arith.constant 0 : i32
    %c0_i32_0 = arith.constant 0 : i32
    %c0_i32_1 = arith.constant 0 : i32
    return %c0_i32, %c0_i32_0 : i32, i32
  }
  func.func @transform_2(%arg0: i32) -> (i32, i32) {
    %c0_i32 = arith.constant 0 : i32
    %c0_i32_0 = arith.constant 0 : i32
    return %c0_i32, %arg0 : i32, i32
  }
  func.func @transform_3(%arg0: i32) -> (i32, i32) {
    %c0_i32 = arith.constant 0 : i32
    %c0_i32_0 = arith.constant 0 : i32
    return %c0_i32, %arg0 : i32, i32
  }
  func.func @transform_4(%arg0: i32) -> (i32, i32) {
    %c0_i32 = arith.constant 0 : i32
    %c0_i32_0 = arith.constant 0 : i32
    return %c0_i32, %arg0 : i32, i32
  }
}

</mosaic_0001>

<bundles_post_ra>
// kernel: tpu_custom_call.1
= control target key start
LH: loop header
LB: loop body
LE: loop exit
PB: predicated region body
PF: predicated region fallthrough
CT: control target
= control target key end

     0   :  { %9 = vsyncpa [#allocation3], 0  ;;  %s350_s0 = inlined_call_operand.hbm [shape: f32[8,64], index: 0, kind: input, shape index: {}]   ;;  %s351_s1 = inlined_call_operand.vmem [shape: f32[1,64], index: 1, kind: input, shape index: {}]   ;;  %s352_s2 = inlined_call_operand.hbm [shape: bf16[64,128], index: 2, kind: input, shape index: {}]   ;;  %s353_s3 = inlined_call_operand.vmem [shape: f32[1,128], index: 3, kind: input, shape index: {}]   ;;  %s354_s4 = inlined_call_operand.hbm [shape: f32[8,128], index: 4, kind: output, shape index: {}]  }
   0x1   :  { %10 = vsyncpa [#allocation6], 0 }
   0x2   :  { %11 = vsyncpa [#allocation4], 0  ;;  %s301_s15 = smov [#allocation2]   ;;  %s302_s17 = smov [#allocation5]  }
   0x3   :  { %s18_s16 = sshll.u32 %s301_s15, 4  ;;  %s29_s18 = sshll.u32 %s302_s17, 4  ;;  %s19_s16 = int_to_ptr.vmem [resolvable:$true] %s18_s16  ;;  %s30_s18 = int_to_ptr.vmem [resolvable:$true] %s29_s18 }
   0x4   :  { %s243_s19 = scalar_lea.vmem %s19_s16, 128  ;;  %p248_p1 = scmp.lt.s32.totalorder %s19_s16, %s19_s16 }
   0x5   :  { %p244_p0 = scmp.ne.s32.totalorder %s19_s16, %s243_s19  ;;  %p249_p2 = scmp.lt.s32.totalorder %s243_s19, %s243_s19 }
   0x7   :  { %p250_p3 = por %p249_p2, %p248_p1 }
   0x9   :  { %p251_p4 = pnand %p250_p3, %p244_p0 }
   0xb   :  { %254 = shalt.err (!%p251_p4)
}
   0xc   :  { %21 = dma.hbm_to_vmem [thread:$0]  %s350_s0, 128, %s19_s16, [#allocation3]  }
   0xd   :  { %s263_s22 = scalar_lea.vmem %s30_s18, 512  ;;  %p268_p6 = scmp.lt.s32.totalorder %s30_s18, %s30_s18 }
   0xe   :  { %p264_p5 = scmp.ne.s32.totalorder %s30_s18, %s263_s22  ;;  %p269_p7 = scmp.lt.s32.totalorder %s263_s22, %s263_s22 }
  0x10   :  { %p270_p8 = por %p269_p7, %p268_p6 }
  0x12   :  { %p271_p9 = pnand %p270_p8, %p264_p5 }
  0x14   :  { %274 = shalt.err (!%p271_p9)
}
  0x15   :  { %s303_s23 = smov 64   ;;  %s304_s24 = smov 4  }
  0x16   :  { %35 = dma.hbm_to_vmem [thread:$0]  %s352_s2, 512, %s30_s18, [#allocation6], %s303_s23, %s303_s23, %s304_s24  }
  0x17   :  { %295 = dma.done.wait [#allocation3], 128  }
  0x18   :  { %296 = vsyncadd [#allocation3], 4294967168 }
  0x19   :  { %297 = dma.done.wait [#allocation6], 512  }
  0x1a   :  { %298 = vsyncadd [#allocation6], 4294966784  ;;  %v44_v0 = vld [vmem:[#allocation2] sm:$0xff]  ;;  %vm47_vm0 = vcmask 523264   ;;  %v196_v4 = vld [vmem:[#allocation5 + $0x10] sm:$0xff]   ;;  %v305_v5 = vmov 0.0  }
  0x1b   :  { %v46_v1 = vmul.f32 %v44_v0, %v44_v0  ;;  %v197_v3 = vld [vmem:[#allocation5 + $0x18] sm:$0xff]   ;;  %207 = vmatprep.subr.mxu0 %v305_v5  ;;  %vm306_vm1 = vmmov 0   ;;  %v190_v8 = vunpack.c.h.bf16 %v196_v4  ;;  %v195_v9 = vld [vmem:[#allocation5 + $0x8] sm:$0xff]   ;;  %v189_v10 = vunpack.c.l.bf16 %v196_v4  ;;  %v180_v12 = vld [vmem:[#allocation5] sm:$0xff]   ;;  %s307_s29 = smov [#allocation7]  }
  0x1c   :  { %v193_v6 = vunpack.c.l.bf16 %v197_v3  ;;  %v194_v7 = vunpack.c.h.bf16 %v197_v3  ;;  %223 = vmatprep.mubr.msk.f32.mxu0 %vm306_vm1, %v305_v5  ;;  %v186_v11 = vunpack.c.h.bf16 %v195_v9  ;;  %v185_v13 = vunpack.c.l.bf16 %v195_v9  ;;  %v176_v20 = vld [vmem:[%s351_s1] ss:$0 sm:$0xff]  ;;  %s166_s30 = sshll.u32 %s307_s29, 4  ;;  %s167_s30 = int_to_ptr.vmem [resolvable:$true] %s166_s30 }
  0x1d   :  { %v48_v2 = vsel %vm47_vm0, %v46_v1, 0.0  ;;  %v182_v14 = vunpack.c.h.bf16 %v180_v12  ;;  %v181_v15 = vunpack.c.l.bf16 %v180_v12  ;;  %v177_v23 = vld [vmem:[%s353_s3] ss:$0 sm:$0xff]  ;;  %s275_s5 = scalar_lea.vmem %s167_s30, 128  ;;  %p280_p11 = scmp.lt.s32.totalorder %s167_s30, %s167_s30 }
  0x1e   :  { %49 = vadd.xlane.f32.xlu0 %v48_v2  ;;  %208 = vmatpush3.msra.mxu0 %v194_v7  ;;  %p276_p10 = scmp.ne.s32.totalorder %s167_s30, %s275_s5  ;;  %p281_p12 = scmp.lt.s32.totalorder %s275_s5, %s275_s5 }
  0x1f   :  { %209 = vmatprep.subr.mxu0 %v305_v5 }
  0x20   :  { %210 = vmatpush3.msra.mxu0 %v193_v6  ;;  %p282_p13 = por %p281_p12, %p280_p11 }
  0x21   :  { %211 = vmatprep.subr.mxu0 %v305_v5 }
  0x22   :  { %212 = vmatpush3.msra.mxu0 %v190_v8  ;;  %p283_p0 = pnand %p282_p13, %p276_p10 }
  0x23   :  { %213 = vmatprep.subr.mxu0 %v305_v5 }
  0x24   :  { %214 = vmatpush3.msra.mxu0 %v189_v10 }
  0x25   :  { %215 = vmatprep.subr.mxu0 %v305_v5 }
  0x26   :  { %216 = vmatpush3.msra.mxu0 %v186_v11 }
  0x27   :  { %217 = vmatprep.subr.mxu0 %v305_v5 }
  0x28   :  { %218 = vmatpush3.msra.mxu0 %v185_v13 }
  0x29   :  { %219 = vmatprep.subr.mxu0 %v305_v5 }
  0x2a   :  { %220 = vmatpush3.msra.mxu0 %v182_v14 }
  0x2b   :  { %221 = vmatprep.subr.mxu0 %v305_v5 }
  0x2c   :  { %222 = vmatpush3.msra.mxu0 %v181_v15 }
  0xa7   :  { %v50_v16 = vpop.xlane.xlu0 %49 }
  0xa8   :  { %v52_v17 = vmul.f32 0.015625, %v50_v16 }
  0xaa   :  { %v53_v18 = vadd.f32 1e-06, %v52_v17 }
  0xac   :  { %233 = vrsqrt.f32 %v53_v18 }
  0xb9   :  { %v234_v19 = vpop.eup %233 }
  0xba   :  { %v55_v21 = vmul.f32 %v234_v19, %v44_v0 }
  0xbc   :  { %v62_v22 = vmul.f32 %v176_v20, %v55_v21 }
  0xbe   :  { %224 = vmatmul.mubr.msk.f32.vlgmr.msra.gmra.mxu0 %vm47_vm0, %v62_v22 }
 0x17e   :  { %v155_v24 = vpop.f32.mrf.mxu0 }
 0x17f   :  { %v156_v25 = vadd.f32 %v177_v23, %v155_v24 }
 0x180   :  { %v225_v26 = vpop.f32.mrf.mxu0 }
 0x181   :  { %159 = vst [vmem:[#allocation7] sm:$0xff] %v156_v25 }
 0x182   :  { %286 = shalt.err (!%p283_p0)
}
 0x183   :  { %169 = dma.vmem_to_hbm [thread:$0]  %s167_s30, 128, %s354_s4, [#allocation4]  }
 0x184   :  { %299 = dma.done.wait [#allocation4], 128  }
 0x185   :  { %300 = vsyncadd [#allocation4], 4294967168 }
 0x186   :  { %173 = vsyncpa [#allocation3], 1 }
 0x187   :  { %174 = vsyncpa [#allocation6], 1 }
 0x188   :  { %175 = vsyncpa [#allocation4], 1 }

</bundles_post_ra>
